<compile_context>
chip_gen: v6e
topology: v6e:2x2x1
jax: 0.10.0
libtpu: 0.0.40
codegen_flags: <defaults>
</compile_context>

<pallas_src>
import math
from functools import partial

import jax
import jax.numpy as jnp
from jax.experimental import pallas as pl
from jax.experimental.pallas import tpu as pltpu


# ----------------------------------------------------------------------------
# generation-aware VMEM budget and feature probes
# ----------------------------------------------------------------------------

def _vmem_limit_bytes():
    try:
        cap = int(pltpu.get_tpu_info().vmem_capacity_bytes)
    except Exception:
        cap = 64 * 1024 * 1024          # conservative fallback (v7x-sized)
    # ~100 MB on 128 MiB parts (v5e/v6e), ~50 MB on 64 MiB parts (v7x).
    return max(32 * 1024 * 1024, min(100 * 1024 * 1024, int(cap * 0.78)))


_VMEM_LIMIT = _vmem_limit_bytes()
_ROW_TILE_PREF = 512 if _VMEM_LIMIT >= 96 * 1024 * 1024 else 256


def _probe_copy_kernel(x_ref, o_ref):
    o_ref[...] = x_ref[...]


def _probe_single_buffering():
    """Check whether pipeline_mode=pl.Buffered(1) is supported at runtime."""
    try:
        x = jnp.zeros((8, 128), jnp.float32)
        out = pl.pallas_call(
            _probe_copy_kernel,
            out_shape=jax.ShapeDtypeStruct((16, 128), jnp.float32),
            grid=(2,),
            in_specs=[pl.BlockSpec((8, 128), lambda i: (0, 0),
                                   pipeline_mode=pl.Buffered(1))],
            out_specs=pl.BlockSpec((8, 128), lambda i: (i, 0)),
        )(x)
        jax.block_until_ready(out)
        return True
    except Exception:
        return False


_SINGLE_BUFFER_OK = _probe_single_buffering()


def _const_spec(block_shape, index_map):
    """BlockSpec for weights/biases whose index_map is constant across the grid.

    They never change between grid steps, so double-buffering them is pure
    VMEM waste -> request single buffering when the runtime supports it.
    """
    if _SINGLE_BUFFER_OK:
        return pl.BlockSpec(block_shape, index_map, pipeline_mode=pl.Buffered(1))
    return pl.BlockSpec(block_shape, index_map)


# ----------------------------------------------------------------------------
# tile-size helpers (demo shapes fall back to full blocks)
# ----------------------------------------------------------------------------

def _row_tile(M, pref=None):
    pref = _ROW_TILE_PREF if pref is None else pref
    if M <= pref:
        return M
    for t in (pref, 256, 128, 64, 32, 16, 8):
        if t <= M and M % t == 0:
            return t
    return M


def _q_tile(S, pref=256):
    if S <= pref:
        return S
    for t in (pref, 128, 64, 32, 16, 8):
        if S % t == 0:
            return t
    return S


def _kv_tile(S, H):
    # Prefer keeping the full K/V sequence resident: the kv grid axis then has
    # length 1 and K/V are DMA'd exactly once per (batch, layer).
    kv_bytes = 2 * 2 * 2 * S * H        # K+V tiles, bf16, double-buffered
    if S <= 128 or kv_bytes <= 24 * 1024 * 1024:
        return S
    for t in (512, 256, 128):
        if S % t == 0:
            return t
    return S


def _ffn_tile(F):
    if F <= 1024:
        return F
    for t in (1024, 512, 256):
        if F % t == 0:
            return t
    return F


# ----------------------------------------------------------------------------
# Pallas kernels
# ----------------------------------------------------------------------------

def _ln_qkv_kernel(x_ref, g_ref, b_ref, w_ref, bias_ref, q_ref, k_ref, v_ref):
    """Fused pre-LayerNorm + QKV projection (single (H,3H) matmul)."""
    x = x_ref[...].astype(jnp.float32)
    mu = jnp.mean(x, axis=-1, keepdims=True)
    var = jnp.mean(jnp.square(x - mu), axis=-1, keepdims=True)
    h = (x - mu) * jax.lax.rsqrt(var + 1e-5) * g_ref[...] + b_ref[...]
    y = jnp.dot(h.astype(w_ref.dtype), w_ref[...],
                preferred_element_type=jnp.float32) + bias_ref[...]
    H = q_ref.shape[-1]
    q_ref[...] = y[:, :H].astype(q_ref.dtype)
    k_ref[...] = y[:, H:2 * H].astype(k_ref.dtype)
    v_ref[...] = y[:, 2 * H:].astype(v_ref.dtype)


def ln_qkv(x, g, b, w, bias):
    M, H = x.shape
    N = w.shape[1]
    TM = _row_tile(M)
    return pl.pallas_call(
        _ln_qkv_kernel,
        out_shape=(jax.ShapeDtypeStruct((M, H), x.dtype),
                   jax.ShapeDtypeStruct((M, H), x.dtype),
                   jax.ShapeDtypeStruct((M, H), x.dtype)),
        grid=(M // TM,),
        in_specs=[pl.BlockSpec((TM, H), lambda i: (i, 0)),
                  _const_spec((1, H), lambda i: (0, 0)),
                  _const_spec((1, H), lambda i: (0, 0)),
                  _const_spec((H, N), lambda i: (0, 0)),
                  _const_spec((1, N), lambda i: (0, 0))],
        out_specs=[pl.BlockSpec((TM, H), lambda i: (i, 0)),
                   pl.BlockSpec((TM, H), lambda i: (i, 0)),
                   pl.BlockSpec((TM, H), lambda i: (i, 0))],
        compiler_params=pltpu.CompilerParams(
            dimension_semantics=("parallel",),
            vmem_limit_bytes=_VMEM_LIMIT),
    )(x, g.reshape(1, H), b.reshape(1, H), w, bias.reshape(1, N))


def _flash_attn_kernel(q_ref, k_ref, v_ref, bias_ref, o_ref,
                       m_sc, l_sc, acc_sc, *, num_heads, scale):
    """Flash attention: KV-tiled grid axis, online softmax.

    Scratch layout: m/l packed as (tq, num_heads); accumulator packed as a
    single (tq, H) f32 slab (heads concatenated on lanes) so the finalize is
    one full-lane store.
    """
    kv_idx = pl.program_id(1)

    @pl.when(kv_idx == 0)
    def _():
        m_sc[...] = jnp.full(m_sc.shape, -jnp.inf, dtype=m_sc.dtype)
        l_sc[...] = jnp.zeros(l_sc.shape, dtype=l_sc.dtype)
        acc_sc[...] = jnp.zeros(acc_sc.shape, dtype=acc_sc.dtype)

    H = q_ref.shape[-1]
    dh = H // num_heads
    bias = bias_ref[0].astype(jnp.float32)                     # (1, tk)

    # NOTE: num_heads is a compile-time constant; if bundle dumps show vreg
    # spills at 20 heads, convert to lax.fori_loop with pl.ds lane slices.
    for h in range(num_heads):
        sl = slice(h * dh, (h + 1) * dh)
        qh = q_ref[0, :, sl]                                   # (tq, dh)
        kh = k_ref[0, :, sl]                                   # (tk, dh)
        vh = v_ref[0, :, sl]                                   # (tk, dh)
        s = jax.lax.dot_general(qh, kh, (((1,), (1,)), ((), ())),
                                preferred_element_type=jnp.float32) * scale
        s = s + bias                                           # key-padding mask
        m_prev = m_sc[:, h:h + 1]                              # (tq, 1)
        m_new = jnp.maximum(m_prev, jnp.max(s, axis=-1, keepdims=True))
        alpha = jnp.exp(m_prev - m_new)
        p = jnp.exp(s - m_new)
        l_sc[:, h:h + 1] = alpha * l_sc[:, h:h + 1] + jnp.sum(p, axis=-1,
                                                              keepdims=True)
        acc_sc[:, sl] = alpha * acc_sc[:, sl] + jax.lax.dot_general(
            p.astype(vh.dtype), vh, (((1,), (0,)), ((), ())),
            preferred_element_type=jnp.float32)
        m_sc[:, h:h + 1] = m_new

    @pl.when(kv_idx == pl.num_programs(1) - 1)
    def _():
        for h in range(num_heads):
            sl = slice(h * dh, (h + 1) * dh)
            inv = pl.reciprocal(l_sc[:, h:h + 1], approx=True)   # EUP slot
            acc_sc[:, sl] = acc_sc[:, sl] * inv
        o_ref[0] = acc_sc[...].astype(o_ref.dtype)               # one full-lane store


def flash_attention(q, k, v, bias, *, num_heads):
    """q,k,v: (B,S,H); bias: (B,1,S) additive key-mask; returns (B,S,H)."""
    B, S, H = q.shape
    dh = H // num_heads
    tq = _q_tile(S)
    tk = _kv_tile(S, H)
    nq = S // tq
    nkv = S // tk
    # Batch folded into the q-tile axis -> one large "parallel" axis that
    # shards evenly across the 2 TensorCores on v7x.
    return pl.pallas_call(
        partial(_flash_attn_kernel, num_heads=num_heads,
                scale=1.0 / math.sqrt(dh)),
        out_shape=jax.ShapeDtypeStruct((B, S, H), q.dtype),
        grid=(B * nq, nkv),
        in_specs=[pl.BlockSpec((1, tq, H), lambda i, kv: (i // nq, i % nq, 0)),
                  pl.BlockSpec((1, tk, H), lambda i, kv: (i // nq, kv, 0)),
                  pl.BlockSpec((1, tk, H), lambda i, kv: (i // nq, kv, 0)),
                  pl.BlockSpec((1, 1, tk), lambda i, kv: (i // nq, 0, kv))],
        out_specs=pl.BlockSpec((1, tq, H), lambda i, kv: (i // nq, i % nq, 0)),
        scratch_shapes=[pltpu.VMEM((tq, num_heads), jnp.float32),   # m
                        pltpu.VMEM((tq, num_heads), jnp.float32),   # l
                        pltpu.VMEM((tq, H), jnp.float32)],          # acc
        compiler_params=pltpu.CompilerParams(
            dimension_semantics=("parallel", "arbitrary"),
            vmem_limit_bytes=_VMEM_LIMIT),
    )(q, k, v, bias)


def _proj_ffn_kernel(a_ref, wo_ref, bo_ref, r_ref, g_ref, b_ref,
                     w1_ref, b1_ref, w2_ref, b2_ref, o_ref,
                     x_sc, h_sc, acc_sc):
    """Fused attention-output-projection + residual + pre-LN + FFN + residual.

    The FFN intermediate dimension F is tiled via the last ("arbitrary") grid
    axis; w1/w2 blocks stream through VMEM and the second matmul accumulates
    into a (TM, H) f32 scratch.
    """
    fk = pl.program_id(1)

    @pl.when(fk == 0)
    def _():
        x = jnp.dot(a_ref[...], wo_ref[...],
                    preferred_element_type=jnp.float32) + bo_ref[...]
        x = x + r_ref[...].astype(jnp.float32)                  # residual 1
        x_sc[...] = x
        mu = jnp.mean(x, axis=-1, keepdims=True)
        var = jnp.mean(jnp.square(x - mu), axis=-1, keepdims=True)
        h_sc[...] = ((x - mu) * jax.lax.rsqrt(var + 1e-5) * g_ref[...]
                     + b_ref[...]).astype(h_sc.dtype)
        acc_sc[...] = jnp.zeros(acc_sc.shape, acc_sc.dtype)

    h = jnp.dot(h_sc[...], w1_ref[...],
                preferred_element_type=jnp.float32) + b1_ref[...]
    # NOTE: tanh-approx GELU (EUP-friendly); use approximate=False for exact
    # erf parity with PyTorch/ESM2.
    h = jax.nn.gelu(h)
    acc_sc[...] += jnp.dot(h.astype(w2_ref.dtype), w2_ref[...],
                           preferred_element_type=jnp.float32)

    @pl.when(fk == pl.num_programs(1) - 1)
    def _():
        o_ref[...] = (x_sc[...] + acc_sc[...] + b2_ref[...]).astype(o_ref.dtype)


def proj_ffn_residual(a, wo, bo, resid, g, b, w1, b1, w2, b2):
    M, H = a.shape
    F = w1.shape[1]
    TM = _row_tile(M)
    TF = _ffn_tile(F)
    return pl.pallas_call(
        _proj_ffn_kernel,
        out_shape=jax.ShapeDtypeStruct((M, H), resid.dtype),
        grid=(M // TM, F // TF),
        in_specs=[pl.BlockSpec((TM, H), lambda i, k: (i, 0)),    # attn output
                  _const_spec((H, H), lambda i, k: (0, 0)),      # wo
                  _const_spec((1, H), lambda i, k: (0, 0)),      # bo
                  pl.BlockSpec((TM, H), lambda i, k: (i, 0)),    # residual x
                  _const_spec((1, H), lambda i, k: (0, 0)),      # ln2 gamma
                  _const_spec((1, H), lambda i, k: (0, 0)),      # ln2 beta
                  pl.BlockSpec((H, TF), lambda i, k: (0, k)),    # w1 F-tile
                  pl.BlockSpec((1, TF), lambda i, k: (0, k)),    # b1 F-tile
                  pl.BlockSpec((TF, H), lambda i, k: (k, 0)),    # w2 F-tile
                  _const_spec((1, H), lambda i, k: (0, 0))],     # b2
        out_specs=pl.BlockSpec((TM, H), lambda i, k: (i, 0)),
        scratch_shapes=[pltpu.VMEM((TM, H), jnp.float32),    # x (proj+residual)
                        pltpu.VMEM((TM, H), jnp.bfloat16),   # LN'd activations
                        pltpu.VMEM((TM, H), jnp.float32)],   # FFN accumulator
        compiler_params=pltpu.CompilerParams(
            dimension_semantics=("parallel", "arbitrary"),
            vmem_limit_bytes=_VMEM_LIMIT),
    )(a, wo, bo.reshape(1, H), resid, g.reshape(1, H), b.reshape(1, H),
      w1, b1.reshape(1, F), w2, b2.reshape(1, H))


def _layernorm_kernel(x_ref, g_ref, b_ref, o_ref):
    x = x_ref[...].astype(jnp.float32)
    mu = jnp.mean(x, axis=-1, keepdims=True)
    var = jnp.mean(jnp.square(x - mu), axis=-1, keepdims=True)
    o_ref[...] = ((x - mu) * jax.lax.rsqrt(var + 1e-5) * g_ref[...]
                  + b_ref[...]).astype(o_ref.dtype)


def layernorm(x, g, b, *, out_dtype=jnp.float32):
    M, H = x.shape
    TM = _row_tile(M)
    return pl.pallas_call(
        _layernorm_kernel,
        out_shape=jax.ShapeDtypeStruct((M, H), out_dtype),
        grid=(M // TM,),
        in_specs=[pl.BlockSpec((TM, H), lambda i: (i, 0)),
                  _const_spec((1, H), lambda i: (0, 0)),
                  _const_spec((1, H), lambda i: (0, 0))],
        out_specs=pl.BlockSpec((TM, H), lambda i: (i, 0)),
        compiler_params=pltpu.CompilerParams(
            dimension_semantics=("parallel",),
            vmem_limit_bytes=_VMEM_LIMIT),
    )(x, g.reshape(1, H), b.reshape(1, H))


def _classifier_kernel(x_ref, w1_ref, b1_ref, g1_ref, be1_ref,
                       w2_ref, b2_ref, g2_ref, be2_ref,
                       w3_ref, b3_ref, o_ref):
    def ln(h, g, b):
        mu = jnp.mean(h, axis=-1, keepdims=True)
        var = jnp.mean(jnp.square(h - mu), axis=-1, keepdims=True)
        return (h - mu) * jax.lax.rsqrt(var + 1e-5) * g + b

    h = jnp.dot(x_ref[...], w1_ref[...],
                preferred_element_type=jnp.float32) + b1_ref[...]
    h = jnp.maximum(ln(h, g1_ref[...], be1_ref[...]), 0.0)        # LN -> ReLU
    # Dropout: identity (eval mode)
    h = jnp.dot(h.astype(w2_ref.dtype), w2_ref[...],
                preferred_element_type=jnp.float32) + b2_ref[...]
    h = jnp.maximum(ln(h, g2_ref[...], be2_ref[...]), 0.0)
    o_ref[...] = jnp.dot(h.astype(w3_ref.dtype), w3_ref[...],
                         preferred_element_type=jnp.float32) + b3_ref[...]


def classifier(x, p):
    """Fused head: Linear(7H,256)+LN+ReLU -> Linear(256,64)+LN+ReLU -> Linear(64,1)."""
    # TODO(synk): tiny lane-sparse (B,1) output; acceptable as a single small launch.
    B, C = x.shape
    full = lambda shape: pl.BlockSpec(shape, lambda i: (0,) * len(shape))
    return pl.pallas_call(
        _classifier_kernel,
        out_shape=jax.ShapeDtypeStruct((B, 1), jnp.float32),
        grid=(1,),
        in_specs=[full((B, C)),
                  full((C, 256)), full((1, 256)), full((1, 256)), full((1, 256)),
                  full((256, 64)), full((1, 64)), full((1, 64)), full((1, 64)),
                  full((64, 1)), full((1, 1))],
        out_specs=full((B, 1)),
        compiler_params=pltpu.CompilerParams(vmem_limit_bytes=_VMEM_LIMIT),
    )(x,
      p['w1'], p['b1'].reshape(1, 256), p['g1'].reshape(1, 256), p['be1'].reshape(1, 256),
      p['w2'], p['b2'].reshape(1, 64), p['g2'].reshape(1, 64), p['be2'].reshape(1, 64),
      p['w3'], p['b3'].reshape(1, 1))


# ----------------------------------------------------------------------------
# Parameter initialization (deterministic, synthetic)
# ----------------------------------------------------------------------------

def init_params(key, *, vocab, hidden, num_heads, ffn_dim, num_layers,
                window_context):
    def nrm(k, shape, scale=0.02, dtype=jnp.bfloat16):
        return (scale * jax.random.normal(k, shape, jnp.float32)).astype(dtype)

    keys = iter(jax.random.split(key, 8 + 8 * num_layers))
    params = {'embedding': nrm(next(keys), (vocab, hidden)),
              'lnf_g': jnp.ones((hidden,), jnp.float32),
              'lnf_b': jnp.zeros((hidden,), jnp.float32),
              'layers': []}
    for _ in range(num_layers):
        lp = {
            'ln1_g': jnp.ones((hidden,), jnp.float32),
            'ln1_b': jnp.zeros((hidden,), jnp.float32),
            'wqkv': nrm(next(keys), (hidden, 3 * hidden)),       # fused Q|K|V
            'bqkv': jnp.zeros((3 * hidden,), jnp.float32),
            'wo': nrm(next(keys), (hidden, hidden)),
            'bo': jnp.zeros((hidden,), jnp.float32),
            'ln2_g': jnp.ones((hidden,), jnp.float32),
            'ln2_b': jnp.zeros((hidden,), jnp.float32),
            'wf1': nrm(next(keys), (hidden, ffn_dim)),
            'bf1': jnp.zeros((ffn_dim,), jnp.float32),
            'wf2': nrm(next(keys), (ffn_dim, hidden)),
            'bf2': jnp.zeros((hidden,), jnp.float32),
        }
        params['layers'].append(lp)

    context_size = hidden * (2 * window_context + 1)
    params['cls'] = {
        'w1': nrm(next(keys), (context_size, 256), dtype=jnp.bfloat16),
        'b1': jnp.zeros((256,), jnp.float32),
        'g1': jnp.ones((256,), jnp.float32), 'be1': jnp.zeros((256,), jnp.float32),
        'w2': nrm(next(keys), (256, 64), dtype=jnp.bfloat16),
        'b2': jnp.zeros((64,), jnp.float32),
        'g2': jnp.ones((64,), jnp.float32), 'be2': jnp.zeros((64,), jnp.float32),
        'w3': nrm(next(keys), (64, 1), dtype=jnp.bfloat16),
        'b3': jnp.zeros((1,), jnp.float32),
    }
    return params


# ----------------------------------------------------------------------------
# Forward pass
# ----------------------------------------------------------------------------

def phos_transformer_forward(params, input_ids, attention_mask, *,
                             num_heads, window_context):
    B, S = input_ids.shape
    emb = params['embedding']
    H = emb.shape[1]
    M = B * S

    x = emb[input_ids].reshape(M, H)                              # bf16 glue gather
    # additive key-padding-mask bias, precomputed once: 0 = attend, -1e9 = masked
    mask_bias = ((attention_mask.astype(jnp.float32) - 1.0) * 1e9).reshape(B, 1, S)

    for lp in params['layers']:
        # --- self-attention block (pre-LN, fused LN+QKV, flash attention) ---
        q, k, v = ln_qkv(x, lp['ln1_g'], lp['ln1_b'], lp['wqkv'], lp['bqkv'])
        a = flash_attention(q.reshape(B, S, H), k.reshape(B, S, H),
                            v.reshape(B, S, H), mask_bias, num_heads=num_heads)
        # --- fused out-proj + residual + pre-LN + FFN(F-tiled) + residual ---
        x = proj_ffn_residual(a.reshape(M, H), lp['wo'], lp['bo'], x,
                              lp['ln2_g'], lp['ln2_b'],
                              lp['wf1'], lp['bf1'], lp['wf2'], lp['bf2'])

    # --- PhosTransformer head: gather the center window FIRST, then apply the
    #     final encoder LayerNorm only to those (2w+1) rows per batch ---
    center = S // 2
    w = window_context
    lo, hi = center - w, center + w + 1
    xb = x.reshape(B, S, H)
    if lo >= 0 and hi <= S:
        # window is contiguous in S -> one slice, LN on B*(2w+1) rows only
        win = jax.lax.slice(xb, (0, lo, 0), (B, hi, H)).reshape(B * (2 * w + 1), H)
        win = layernorm(win, params['lnf_g'], params['lnf_b'],
                        out_dtype=jnp.float32)
        concat_features = win.reshape(B, (2 * w + 1) * H)
    else:
        feats = []
        for i in range(-w, w + 1):
            pos = center + i
            if pos < 0 or pos >= S:
                feats.append(jnp.zeros((B, H), jnp.float32))
            else:
                feats.append(layernorm(xb[:, pos, :], params['lnf_g'],
                                       params['lnf_b'], out_dtype=jnp.float32))
        concat_features = jnp.concatenate(feats, axis=1)

    logits = classifier(concat_features.astype(jnp.bfloat16), params['cls'])
    return logits.squeeze(-1)                                     # (B,)


# ----------------------------------------------------------------------------
# Demo
# ----------------------------------------------------------------------------

if __name__ == "__main__":
    B, S = 2, 16
    HIDDEN, NUM_HEADS, FFN_DIM, LAYERS = 32, 2, 64, 2
    VOCAB, WINDOW_CONTEXT = 33, 3

    key = jax.random.PRNGKey(0)
    k_param, k_ids = jax.random.split(key)
    params = init_params(k_param, vocab=VOCAB, hidden=HIDDEN,
                         num_heads=NUM_HEADS, ffn_dim=FFN_DIM,
                         num_layers=LAYERS, window_context=WINDOW_CONTEXT)

    input_ids = jax.random.randint(k_ids, (B, S), 0, VOCAB, dtype=jnp.int32)
    attention_mask = jnp.ones((B, S), jnp.int32)
    attention_mask = attention_mask.at[1, S - 3:].set(0)   # pad tail of sample 1

    logits = phos_transformer_forward(params, input_ids, attention_mask,
                                      num_heads=NUM_HEADS,
                                      window_context=WINDOW_CONTEXT)
    jax.block_until_ready(logits)
    assert logits.shape == (B,) and logits.dtype == jnp.float32
    print("KERNEL_OK")
</pallas_src>

<mosaic_0001>
module attributes {stable_mosaic.version = 11 : i64} {
  func.func @_probe_copy_kernel(%arg0: i32, %arg1: memref<8x128xf32, #tpu.memory_space<vmem>>, %arg2: memref<8x128xf32, #tpu.memory_space<vmem>>) attributes {dimension_semantics = [#tpu.dimension_semantics<arbitrary>], iteration_bounds = array<i64: 2>, scalar_prefetch = 0 : i64, scratch_operands = 0 : i64, tpu.core_type = #tpu.core_type<tc>, window_params = [{pipeline_mode = #tpu.pipeline_mode<synchronous>, transform_indices = @transform_0, window_bounds = array<i64: 8, 128>}, {transform_indices = @transform_1, window_bounds = array<i64: 8, 128>}]} {
    %c0 = arith.constant 0 : index
    %c0_0 = arith.constant 0 : index
    %0 = vector.load %arg1[%c0, %c0_0] : memref<8x128xf32, #tpu.memory_space<vmem>>, vector<8x128xf32>
    %c0_1 = arith.constant 0 : index
    %c0_2 = arith.constant 0 : index
    %1 = vector.load %arg2[%c0_1, %c0_2] : memref<8x128xf32, #tpu.memory_space<vmem>>, vector<8x128xf32>
    tpu.vector_store %arg2[%c0_1, %c0_2], %0 {strides = array<i32>} : memref<8x128xf32, #tpu.memory_space<vmem>>, vector<8x128xf32>,
    return
  }
  func.func @transform_0(%arg0: i32) -> (i32, i32) {
    %c0_i32 = arith.constant 0 : i32
    %c0_i32_0 = arith.constant 0 : i32
    %c0_i32_1 = arith.constant 0 : i32
    return %c0_i32, %c0_i32_0 : i32, i32
  }
  func.func @transform_1(%arg0: i32) -> (i32, i32) {
    %c0_i32 = arith.constant 0 : i32
    %c0_i32_0 = arith.constant 0 : i32
    return %arg0, %c0_i32 : i32, i32
  }
}

module attributes {stable_mosaic.version = 11 : i64} {
  func.func @_ln_qkv_kernel(%arg0: i32, %arg1: memref<32x32xbf16, #tpu.memory_space<vmem>>, %arg2: memref<1x32xf32, #tpu.memory_space<vmem>>, %arg3: memref<1x32xf32, #tpu.memory_space<vmem>>, %arg4: memref<32x96xbf16, #tpu.memory_space<vmem>>, %arg5: memref<1x96xf32, #tpu.memory_space<vmem>>, %arg6: memref<32x32xbf16, #tpu.memory_space<vmem>>, %arg7: memref<32x32xbf16, #tpu.memory_space<vmem>>, %arg8: memref<32x32xbf16, #tpu.memory_space<vmem>>) attributes {dimension_semantics = [#tpu.dimension_semantics<parallel>], iteration_bounds = array<i64: 1>, scalar_prefetch = 0 : i64, scratch_operands = 0 : i64, tpu.core_type = #tpu.core_type<tc>, window_params = [{transform_indices = @transform_0, window_bounds = array<i64: 32, 32>}, {pipeline_mode = #tpu.pipeline_mode<synchronous>, transform_indices = @transform_1, window_bounds = array<i64: 1, 32>}, {pipeline_mode = #tpu.pipeline_mode<synchronous>, transform_indices = @transform_2, window_bounds = array<i64: 1, 32>}, {pipeline_mode = #tpu.pipeline_mode<synchronous>, transform_indices = @transform_3, window_bounds = array<i64: 32, 96>}, {pipeline_mode = #tpu.pipeline_mode<synchronous>, transform_indices = @transform_4, window_bounds = array<i64: 1, 96>}, {transform_indices = @transform_5, window_bounds = array<i64: 32, 32>}, {transform_indices = @transform_6, window_bounds = array<i64: 32, 32>}, {transform_indices = @transform_7, window_bounds = array<i64: 32, 32>}]} {
    %c0 = arith.constant 0 : index
    %c0_0 = arith.constant 0 : index
    %0 = vector.load %arg1[%c0, %c0_0] : memref<32x32xbf16, #tpu.memory_space<vmem>>, vector<32x32xbf16>
    %1 = arith.extf %0 : vector<32x32xbf16> to vector<32x32xf32>
    %cst = arith.constant dense<0.000000e+00> : vector<32xf32>
    %2 = vector.multi_reduction <add>, %1, %cst [1] : vector<32x32xf32> to vector<32xf32>
    %3 = vector.shape_cast %2 : vector<32xf32> to vector<32x1xf32>
    %cst_1 = arith.constant 3.200000e+01 : f32
    %4 = vector.broadcast %cst_1 : f32 to vector<32x1xf32>
    %5 = arith.divf %3, %4 : vector<32x1xf32>
    %6 = vector.broadcast %5 : vector<32x1xf32> to vector<32x32xf32>
    %7 = arith.subf %1, %6 : vector<32x32xf32>
    %8 = arith.mulf %7, %7 : vector<32x32xf32>
    %cst_2 = arith.constant dense<0.000000e+00> : vector<32xf32>
    %9 = vector.multi_reduction <add>, %8, %cst_2 [1] : vector<32x32xf32> to vector<32xf32>
    %10 = vector.shape_cast %9 : vector<32xf32> to vector<32x1xf32>
    %cst_3 = arith.constant 3.200000e+01 : f32
    %11 = vector.broadcast %cst_3 : f32 to vector<32x1xf32>
    %12 = arith.divf %10, %11 : vector<32x1xf32>
    %13 = vector.broadcast %5 : vector<32x1xf32> to vector<32x32xf32>
    %14 = arith.subf %1, %13 : vector<32x32xf32>
    %cst_4 = arith.constant 9.99999974E-6 : f32
    %15 = vector.broadcast %cst_4 : f32 to vector<32x1xf32>
    %16 = arith.addf %12, %15 : vector<32x1xf32>
    %17 = math.rsqrt %16 : vector<32x1xf32>
    %18 = vector.broadcast %17 : vector<32x1xf32> to vector<32x32xf32>
    %19 = arith.mulf %14, %18 : vector<32x32xf32>
    %c0_5 = arith.constant 0 : index
    %c0_6 = arith.constant 0 : index
    %20 = vector.load %arg2[%c0_5, %c0_6] : memref<1x32xf32, #tpu.memory_space<vmem>>, vector<1x32xf32>
    %21 = vector.broadcast %20 : vector<1x32xf32> to vector<32x32xf32>
    %22 = arith.mulf %19, %21 : vector<32x32xf32>
    %c0_7 = arith.constant 0 : index
    %c0_8 = arith.constant 0 : index
    %23 = vector.load %arg3[%c0_7, %c0_8] : memref<1x32xf32, #tpu.memory_space<vmem>>, vector<1x32xf32>
    %24 = vector.broadcast %23 : vector<1x32xf32> to vector<32x32xf32>
    %25 = arith.addf %22, %24 : vector<32x32xf32>
    %26 = arith.truncf %25 : vector<32x32xf32> to vector<32x32xbf16>
    %c0_9 = arith.constant 0 : index
    %c0_10 = arith.constant 0 : index
    %27 = vector.load %arg4[%c0_9, %c0_10] : memref<32x96xbf16, #tpu.memory_space<vmem>>, vector<32x96xbf16>
    %cst_11 = arith.constant dense<0.000000e+00> : vector<32x96xf32>
    %28 = tpu.matmul %26, %27, %cst_11 {dimension_numbers = #tpu.dot_dimension_numbers<[1], [0], [0], [1], [0, 0, 1, 1], [], []>} : vector<32x32xbf16>, vector<32x96xbf16>, vector<32x96xf32> -> vector<32x96xf32>
    %c0_12 = arith.constant 0 : index
    %c0_13 = arith.constant 0 : index
    %29 = vector.load %arg5[%c0_12, %c0_13] : memref<1x96xf32, #tpu.memory_space<vmem>>, vector<1x96xf32>
    %30 = vector.broadcast %29 : vector<1x96xf32> to vector<32x96xf32>
    %31 = arith.addf %28, %30 : vector<32x96xf32>
    %32 = vector.extract_strided_slice %31 {offsets = [0, 0], sizes = [32, 32], strides = [1, 1]} : vector<32x96xf32> to vector<32x32xf32>
    %33 = arith.truncf %32 : vector<32x32xf32> to vector<32x32xbf16>
    %c0_14 = arith.constant 0 : index
    %c0_15 = arith.constant 0 : index
    %34 = vector.load %arg6[%c0_14, %c0_15] : memref<32x32xbf16, #tpu.memory_space<vmem>>, vector<32x32xbf16>
    tpu.vector_store %arg6[%c0_14, %c0_15], %33 {strides = array<i32>} : memref<32x32xbf16, #tpu.memory_space<vmem>>, vector<32x32xbf16>,
    %35 = vector.extract_strided_slice %31 {offsets = [0, 32], sizes = [32, 32], strides = [1, 1]} : vector<32x96xf32> to vector<32x32xf32>
    %36 = arith.truncf %35 : vector<32x32xf32> to vector<32x32xbf16>
    %c0_16 = arith.constant 0 : index
    %c0_17 = arith.constant 0 : index
    %37 = vector.load %arg7[%c0_16, %c0_17] : memref<32x32xbf16, #tpu.memory_space<vmem>>, vector<32x32xbf16>
    tpu.vector_store %arg7[%c0_16, %c0_17], %36 {strides = array<i32>} : memref<32x32xbf16, #tpu.memory_space<vmem>>, vector<32x32xbf16>,
    %38 = vector.extract_strided_slice %31 {offsets = [0, 64], sizes = [32, 32], strides = [1, 1]} : vector<32x96xf32> to vector<32x32xf32>
    %39 = arith.truncf %38 : vector<32x32xf32> to vector<32x32xbf16>
    %c0_18 = arith.constant 0 : index
    %c0_19 = arith.constant 0 : index
    %40 = vector.load %arg8[%c0_18, %c0_19] : memref<32x32xbf16, #tpu.memory_space<vmem>>, vector<32x32xbf16>
    tpu.vector_store %arg8[%c0_18, %c0_19], %39 {strides = array<i32>} : memref<32x32xbf16, #tpu.memory_space<vmem>>, vector<32x32xbf16>,
    return
  }
  func.func @transform_0(%arg0: i32) -> (i32, i32) {
    %c0_i32 = arith.constant 0 : i32
    %c0_i32_0 = arith.constant 0 : i32
    return %arg0, %c0_i32 : i32, i32
  }
  func.func @transform_1(%arg0: i32) -> (i32, i32) {
    %c0_i32 = arith.constant 0 : i32
    %c0_i32_0 = arith.constant 0 : i32
    %c0_i32_1 = arith.constant 0 : i32
    return %c0_i32, %c0_i32_0 : i32, i32
  }
  func.func @transform_2(%arg0: i32) -> (i32, i32) {
    %c0_i32 = arith.constant 0 : i32
    %c0_i32_0 = arith.constant 0 : i32
    %c0_i32_1 = arith.constant 0 : i32
    return %c0_i32, %c0_i32_0 : i32, i32
  }
  func.func @transform_3(%arg0: i32) -> (i32, i32) {
    %c0_i32 = arith.constant 0 : i32
    %c0_i32_0 = arith.constant 0 : i32
    %c0_i32_1 = arith.constant 0 : i32
    return %c0_i32, %c0_i32_0 : i32, i32
  }
  func.func @transform_4(%arg0: i32) -> (i32, i32) {
    %c0_i32 = arith.constant 0 : i32
    %c0_i32_0 = arith.constant 0 : i32
    %c0_i32_1 = arith.constant 0 : i32
    return %c0_i32, %c0_i32_0 : i32, i32
  }
  func.func @transform_5(%arg0: i32) -> (i32, i32) {
    %c0_i32 = arith.constant 0 : i32
    %c0_i32_0 = arith.constant 0 : i32
    return %arg0, %c0_i32 : i32, i32
  }
  func.func @transform_6(%arg0: i32) -> (i32, i32) {
    %c0_i32 = arith.constant 0 : i32
    %c0_i32_0 = arith.constant 0 : i32
    return %arg0, %c0_i32 : i32, i32
  }
  func.func @transform_7(%arg0: i32) -> (i32, i32) {
    %c0_i32 = arith.constant 0 : i32
    %c0_i32_0 = arith.constant 0 : i32
    return %arg0, %c0_i32 : i32, i32
  }
}

</mosaic_0001>

<bundles_post_ra>
// kernel: tpu_custom_call.1
= control target key start
LH: loop header
LB: loop body
LE: loop exit
PB: predicated region body
PF: predicated region fallthrough
CT: control target
= control target key end

     0   :  { %6 = vsyncpa [#allocation3], 0  ;;  %s453_s0 = inlined_call_operand.hbm [shape: f32[8,128], index: 0, kind: input, shape index: {}]   ;;  %s454_s1 = inlined_call_operand.hbm [shape: f32[16,128], index: 1, kind: output, shape index: {}]  }
   0x1   :  { %7 = vsyncpa [#allocation4], 0 }
   0x2   :  { %9 = vsyncpa [#allocation4 + $0x1], 0  ;;  %s347_s6 = smov 0   ;;  %s349_s7 = smov 0  }
   0x3   :  { %s351_s8 = smov 0   ;;  %s353_s9 = smov 0  }
   0x4 LB: > { %s368_s10 = sadd.s32 4294967295, %s333_s9   ;;  %s183_s11 = sadd.s32 4294967294, %s333_s9   ;;  %s333_s9 = sphi %s353_s9, %s462_s9   ;;  %s329_s8 = sphi %s351_s8, %s461_s8   ;;  %s325_s7 = sphi %s349_s7, %s460_s7   ;;  %s321_s6 = sphi %s347_s6, %s459_s6  }
   0x5   : > { %s372_s12 = sadd.s32 1, %s333_s9   ;;  %s43_s13 = sadd.s32 1, %s329_s8 }
   0x6   : > { %s40_s14 = ssub.s32 %s333_s9, %s372_s12  ;;  %p53_p0 = scmp.ne.s32.totalorder %s329_s8, %s325_s7 }
   0x7   : > { %p41_p1 = scmp.eq.s32.totalorder %s40_s14, 0  ;;  %p54_p2 = scmp.eq.s32.totalorder %s368_s10, 1 }
   0x8   : > { %p59_p3 = scmp.ne.s32.totalorder %s325_s7, %s321_s6  ;;  %p60_p4 = scmp.eq.s32.totalorder %s183_s11, 1 }
   0x9   : > { %s383_s15 = scalar_select %p41_p1, %s329_s8, %s43_s13  }
   0xa   : > { %p385_p5 = por %p54_p2, %p53_p0  ;;  %p389_p6 = por %p60_p4, %p59_p3 }
   0xb   : > { %p184_p7 = scmp.ge.s32.totalorder %s333_s9, 1  ;;  %p67_p8 = scmp.lt.s32.totalorder %s333_s9, 3 }
   0xc   : > { %s456_s17 = scalar_select %p389_p6, 1, 0 }
   0xd   : > { %p207_p9 = scmp.eq.s32.totalorder %s368_s10, 0  ;;  %p396_p10 = pnand %p184_p7, %p67_p8 }
   0xe   : > { %s335_s19 = smov [#allocation2]  }
   0xf   : > { %s80_s20 = sshll.u32 %s335_s19, 4  ;;  %p199_p11 = pneg %p396_p10  ;;  %s81_s20 = int_to_ptr.vmem [resolvable:$true] %s80_s20 }
  0x10   : > { %s254_s21 = scalar_lea.vmem %s81_s20, 128  ;;  %p262_p3 = scmp.lt.s32.totalorder %s81_s20, %s81_s20 }
  0x11   : > { %p200_p12 = pnand %p207_p9, %p199_p11  ;;  %p255_p0 = scmp.ne.s32.totalorder %s81_s20, %s254_s21 }
  0x12   : > { %p263_p4 = scmp.lt.s32.totalorder %s254_s21, %s254_s21 }
  0x13   : > { %p245_p13 = pneg %p200_p12 }
  0x14   : > { %p264_p6 = por %p263_p4, %p262_p3 }
  0x15   : > { %p257_p1 = pnand %p255_p0, %p245_p13 }
  0x17   : > { %p258_p2 = pneg %p257_p1 }
  0x19   : > { %p265_p7 = pnand %p264_p6, %p258_p2 }
  0x1b   : > { %268 = shalt.err (!%p265_p7)
}
  0x1c   : > { %202 = dma.hbm_to_vmem [thread:$0]  (!%p200_p12), %s453_s0, 128, %s81_s20, [#allocation3]  }
  0x1d   : > { %93 = sbr.rel (%p396_p10) target bundleno = 60 (0x3c), region = 24 }
  0x22   : > { %312 = dma.done.wait (%p207_p9), [#allocation3], 128  }
  0x23   : > { %314 = vsyncadd (%p207_p9), [#allocation3], 4294967168  ;;  %s105_s24 = sand.u32 1, %s325_s7   ;;  %s190_s28 = sshll.u32 %s368_s10, 7  ;;  %v108_v0 = vld [vmem:[#allocation2] sm:$0xff] }
  0x24   : > { %s188_s25 = sshll.u32 %s105_s24, 3  ;;  %s122_s2 = scalar_lea.hbm %s454_s1, %s190_s28 }
  0x25   : > { %s107_s26 = scalar_lea.vmem [#allocation5], %s188_s25  ;;  %s111_s3 = scalar_lea.sflag [#allocation4], %s105_s24 }
  0x26   : > { %s124_s27 = sshll.u32 %s107_s26, 4  ;;  %109 = vst [vmem:[%s107_s26] sm:$0xff] %v108_v0  ;;  %s336_s5 = smov [#allocation5]   ;;  %s415_s27 = int_to_ptr.vmem [resolvable:$true] %s124_s27 }
  0x27   : > { %s269_s4 = scalar_lea.vmem %s415_s27, 128  ;;  %s273_s11 = sshll.u32 %s336_s5, 4  ;;  %s274_s11 = int_to_ptr.vmem [resolvable:$false] %s273_s11 }
  0x28   : > { %p270_p6 = scmp.ne.s32.totalorder %s415_s27, %s269_s4  ;;  %s275_s10 = scalar_lea.vmem %s274_s11, 256 }
  0x29   : > { %p276_p10 = scmp.lt.s32.totalorder %s415_s27, %s274_s11  ;;  %p277_p11 = scmp.lt.s32.totalorder %s275_s10, %s269_s4 }
  0x2a   : > { %p271_p8 = pnand %p270_p6, %p385_p5 }
  0x2b   : > { %p278_p12 = por %p277_p11, %p276_p10 }
  0x2c   : > { %p272_p9 = pneg %p271_p8 }
  0x2e   : > { %p279_p13 = pnand %p278_p12, %p272_p9 }
  0x30   : > { %282 = shalt.err (!%p279_p13)
}
  0x31   : > { %s283_s13 = scalar_lea.hbm %s122_s2, 128  ;;  %s287_s19 = scalar_lea.hbm %s454_s1, 256 }
  0x32   : > { %p284_p0 = scmp.ne.s32.totalorder %s122_s2, %s283_s13  ;;  %p288_p3 = scmp.lt.s32.totalorder %s122_s2, %s454_s1 }
  0x33   : > { %p289_p4 = scmp.lt.s32.totalorder %s287_s19, %s283_s13 }
  0x34   : > { %p285_p1 = pnand %p284_p0, %p385_p5 }
  0x35   : > { %p290_p7 = por %p289_p4, %p288_p3 }
  0x36   : > { %p286_p2 = pneg %p285_p1 }
  0x38   : > { %p291_p6 = pnand %p290_p7, %p286_p2 }
  0x3a   : > { %294 = shalt.err (!%p291_p6)
}
  0x3b   : > { %197 = dma.vmem_to_hbm [thread:$0]  (%p385_p5), %s415_s27, 128, %s122_s2, %s111_s3  }
  0x3c PF: > { %p209_p8 = scmp.ge.s32.totalorder %s333_s9, 2  ;;  %s136_s22 = sand.u32 1, %s321_s6  }
  0x3d   : > { %p458_p9 = scmp.ne.s32.totalorder %s456_s17, 0  ;;  %s137_s23 = scalar_lea.sflag [#allocation4], %s136_s22 }
  0x3f   : > { %p204_p10 = pnand %p209_p8, %p458_p9 }
  0x41   : > { %p205_p11 = pneg %p204_p10 }
  0x43   : > { %316 = dma.done.wait (%p205_p11), %s137_s23, 128  }
  0x44   : > { %318 = vsyncadd (%p205_p11), %s137_s23, 4294967168  ;;  %p12_p12 = scmp.ge.s32.totalorder %s372_s12, 4   ;;  %s459_s6 = smov %s325_s7 }
  0x45   : > { %s460_s7 = smov %s329_s8  ;;  %s461_s8 = smov %s383_s15 }
  0x46   : > { %s462_s9 = smov %s372_s12  ;;  %14 = sbr.rel (!%p12_p12) target bundleno = 4 (0x4), region = 61 }
  0x4b   :  { %142 = vsyncpa [#allocation3], 1 }
  0x4c   :  { %144 = vsyncpa [#allocation3 + $0x1], 1 }
  0x4d   :  { %145 = vsyncpa [#allocation4], 1 }
  0x4e   :  { %147 = vsyncpa [#allocation4 + $0x1], 1 }

// kernel: tpu_custom_call.1
= control target key start
LH: loop header
LB: loop body
LE: loop exit
PB: predicated region body
PF: predicated region fallthrough
CT: control target
= control target key end

     0   :  { %13 = vsyncpa [#allocation3], 0  ;;  %s595_s0 = inlined_call_operand.hbm [shape: bf16[32,32], index: 0, kind: input, shape index: {}]   ;;  %s596_s1 = inlined_call_operand.vmem [shape: f32[1,32], index: 1, kind: input, shape index: {}]   ;;  %s597_s2 = inlined_call_operand.vmem [shape: f32[1,32], index: 2, kind: input, shape index: {}]   ;;  %s598_s3 = inlined_call_operand.hbm [shape: bf16[32,96], index: 3, kind: input, shape index: {}]   ;;  %s599_s4 = inlined_call_operand.vmem [shape: f32[1,96], index: 4, kind: input, shape index: {}]   ;;  %s600_s5 = inlined_call_operand.hbm [shape: bf16[32,32], index: 5, kind: output, shape index: {0}]   ;;  %s601_s6 = inlined_call_operand.hbm [shape: bf16[32,32], index: 6, kind: output, shape index: {1}]   ;;  %s602_s7 = inlined_call_operand.hbm [shape: bf16[32,32], index: 7, kind: output, shape index: {2}]  }
   0x1   :  { %14 = vsyncpa [#allocation6], 0 }
   0x2   :  { %15 = vsyncpa [#allocation4], 0 }
   0x3   :  { %16 = vsyncpa [#allocation9], 0  ;;  %s482_s24 = smov [#allocation2]  }
   0x4   :  { %s22_s25 = sshll.u32 %s482_s24, 4  ;;  %s23_s25 = int_to_ptr.vmem [resolvable:$true] %s22_s25 }
   0x5   :  { %s382_s26 = scalar_lea.vmem %s23_s25, 256  ;;  %p387_p1 = scmp.lt.s32.totalorder %s23_s25, %s23_s25 }
   0x6   :  { %p383_p0 = scmp.ne.s32.totalorder %s23_s25, %s382_s26  ;;  %p388_p2 = scmp.lt.s32.totalorder %s382_s26, %s382_s26 }
   0x8   :  { %p389_p3 = por %p388_p2, %p387_p1 }
   0xa   :  { %p390_p4 = pnand %p389_p3, %p383_p0 }
   0xc   :  { %393 = shalt.err (!%p390_p4)
}
   0xd   :  { %s483_s27 = smov 64   ;;  %s484_s28 = smov 4  }
   0xe   :  { %28 = dma.hbm_to_vmem [thread:$0]  %s595_s0, 256, %s23_s25, [#allocation3], %s483_s27, %s483_s27, %s484_s28  }
   0xf   :  { %s485_s8 = smov [#allocation5]  }
  0x10   :  { %s38_s9 = sshll.u32 %s485_s8, 4  ;;  %s39_s9 = int_to_ptr.vmem [resolvable:$true] %s38_s9 }
  0x11   :  { %s402_s10 = scalar_lea.vmem %s39_s9, 256  ;;  %p407_p6 = scmp.lt.s32.totalorder %s39_s9, %s39_s9 }
  0x12   :  { %p403_p5 = scmp.ne.s32.totalorder %s39_s9, %s402_s10  ;;  %p408_p7 = scmp.lt.s32.totalorder %s402_s10, %s402_s10 }
  0x14   :  { %p409_p8 = por %p408_p7, %p407_p6 }
  0x16   :  { %p410_p9 = pnand %p409_p8, %p403_p5 }
  0x18   :  { %413 = shalt.err (!%p410_p9)
}
  0x19   :  { %44 = dma.hbm_to_vmem [thread:$0]  %s598_s3, 256, %s39_s9, [#allocation6], %s483_s27, %s483_s27, %s484_s28  }
  0x1a   :  { %474 = dma.done.wait [#allocation3], 256  }
  0x1b   :  { %475 = vsyncadd [#allocation3], 4294967040 }
  0x1c   :  { %476 = dma.done.wait [#allocation6], 256  }
  0x1d   :  { %477 = vsyncadd [#allocation6], 4294967040  ;;  %v336_v0 = vld [vmem:[#allocation2] sm:$0xff]   ;;  %vm62_vm0 = vcmask 261120   ;;  %v343_v1 = vld [vmem:[#allocation2 + $0x8] sm:$0xff]   ;;  %vm234_vm1 = vcmask 257024  }
  0x1e   :  { %v337_v2 = vunpack.c.l.bf16 %v336_v0  ;;  %v341_v3 = vunpack.c.l.bf16 %v343_v1  ;;  %v338_v4 = vunpack.c.h.bf16 %v336_v0  ;;  %v342_v5 = vunpack.c.h.bf16 %v343_v1  ;;  %v364_v30 = vld [vmem:[#allocation5 + $0x8] sm:$0xff]   ;;  %v365_v31 = vld [vmem:[#allocation5] sm:$0xff]   ;;  %v320_v46 = vld [vmem:[%s596_s1] ss:$0 sm:$0xff] }
  0x1f   :  { %348 = vmatprep.subr.bf16.mxu0 %v364_v30  ;;  %v321_v51 = vld [vmem:[%s597_s2] ss:$0 sm:$0xff]  ;;  %s486_s2 = smov 96  }
  0x20   :  { %v63_v6 = vsel %vm62_vm0, %v337_v2, 0.0  ;;  %v69_v7 = vsel %vm62_vm0, %v341_v3, 0.0  ;;  %v66_v8 = vsel %vm62_vm0, %v338_v4, 0.0  ;;  %v72_v9 = vsel %vm62_vm0, %v342_v5, 0.0  ;;  %349 = vmatpush3.bf16.msra.mxu0 %v364_v30  ;;  %v322_v0 = vld [vmem:[%s599_s4] ss:$0 sm:$0xff] }
  0x21   :  { %64 = vadd.xlane.f32.xlu0 %v63_v6  ;;  %70 = vadd.xlane.f32.xlu1 %v69_v7  ;;  %s487_s4 = smov [#allocation7]  }
  0x22   :  { %350 = vmatprep.subr.bf16.mxu0 %v365_v31  ;;  %s276_s16 = sshll.u32 %s487_s4, 4  ;;  %s277_s16 = int_to_ptr.vmem [resolvable:$true] %s276_s16 }
  0x23   :  { %s414_s17 = scalar_lea.vmem %s277_s16, 256  ;;  %p419_p11 = scmp.lt.s32.totalorder %s277_s16, %s277_s16 }
  0x24   :  { %351 = vmatpush3.bf16.msra.mxu0 %v365_v31  ;;  %p415_p10 = scmp.ne.s32.totalorder %s277_s16, %s414_s17  ;;  %p420_p12 = scmp.lt.s32.totalorder %s414_s17, %s414_s17 }
  0x25   :  { %67 = vadd.xlane.f32.xlu0 %v66_v8  ;;  %73 = vadd.xlane.f32.xlu1 %v72_v9 }
  0x26   :  { %p421_p13 = por %p420_p12, %p419_p11 }
  0x28   :  { %p422_p0 = pnand %p421_p13, %p415_p10 }
  0xaa   :  { %v65_v10 = vpop.xlane.xlu0 %64  ;;  %v71_v11 = vpop.xlane.xlu1 %70 }
  0xab   :  { %v76_v12 = vmul.f32 0.03125, %v65_v10  ;;  %v78_v13 = vmul.f32 0.03125, %v71_v11 }
  0xad   :  { %v80_v14 = vsub.f32 %v337_v2, %v76_v12  ;;  %v82_v15 = vsub.f32 %v341_v3, %v78_v13 }
  0xae   :  { %v68_v16 = vpop.xlane.xlu0 %67  ;;  %v74_v17 = vpop.xlane.xlu1 %73 }
  0xaf   :  { %v77_v18 = vmul.f32 0.03125, %v68_v16  ;;  %v79_v19 = vmul.f32 0.03125, %v74_v17  ;;  %v84_v20 = vmul.f32 %v80_v14, %v80_v14  ;;  %v86_v21 = vmul.f32 %v82_v15, %v82_v15 }
  0xb1   :  { %v81_v22 = vsub.f32 %v338_v4, %v77_v18  ;;  %v83_v23 = vsub.f32 %v342_v5, %v79_v19  ;;  %v88_v24 = vsel %vm62_vm0, %v84_v20, 0.0  ;;  %v94_v25 = vsel %vm62_vm0, %v86_v21, 0.0 }
  0xb2   :  { %89 = vadd.xlane.f32.xlu0 %v88_v24 }
  0xb3   :  { %v85_v26 = vmul.f32 %v81_v22, %v81_v22  ;;  %v87_v27 = vmul.f32 %v83_v23, %v83_v23 }
  0xb5   :  { %v91_v28 = vsel %vm62_vm0, %v85_v26, 0.0  ;;  %v97_v29 = vsel %vm62_vm0, %v87_v27, 0.0 }
  0xb6   :  { %95 = vadd.xlane.f32.xlu0 %v94_v25  ;;  %92 = vadd.xlane.f32.xlu1 %v91_v28 }
  0xba   :  { %98 = vadd.xlane.f32.xlu1 %v97_v29 }
 0x13b   :  { %v90_v32 = vpop.xlane.xlu0 %89 }
 0x13c   :  { %v100_v33 = vmul.f32 0.03125, %v90_v32 }
 0x13e   :  { %v104_v34 = vadd.f32 1e-05, %v100_v33 }
 0x13f   :  { %v93_v35 = vpop.xlane.xlu1 %92  ;;  %v96_v36 = vpop.xlane.xlu0 %95 }
 0x140   :  { %366 = vrsqrt.f32 %v104_v34  ;;  %v101_v37 = vmul.f32 0.03125, %v93_v35  ;;  %v102_v38 = vmul.f32 0.03125, %v96_v36 }
 0x142   :  { %v105_v39 = vadd.f32 1e-05, %v101_v37  ;;  %v106_v40 = vadd.f32 1e-05, %v102_v38 }
 0x143   :  { %v99_v41 = vpop.xlane.xlu1 %98 }
 0x144   :  { %368 = vrsqrt.f32 %v105_v39  ;;  %v103_v42 = vmul.f32 0.03125, %v99_v41 }
 0x145   :  { %370 = vrsqrt.f32 %v106_v40 }
 0x146   :  { %v107_v43 = vadd.f32 1e-05, %v103_v42 }
 0x148   :  { %372 = vrsqrt.f32 %v107_v43 }
 0x14d   :  { %v367_v44 = vpop.eup %366 }
 0x14e   :  { %v112_v45 = vmul.f32 %v367_v44, %v80_v14 }
 0x150   :  { %v123_v50 = vmul.f32 %v320_v46, %v112_v45 }
 0x151   :  { %v369_v47 = vpop.eup %368 }
 0x152   :  { %v371_v48 = vpop.eup %370  ;;  %v113_v49 = vmul.f32 %v369_v47, %v81_v22  ;;  %v134_v55 = vadd.f32 %v321_v51, %v123_v50 }
 0x153   :  { %v114_v52 = vmul.f32 %v371_v48, %v82_v15 }
 0x154   :  { %v124_v53 = vmul.f32 %v320_v46, %v113_v49 }
 0x155   :  { %v373_v54 = vpop.eup %372  ;;  %v125_v58 = vmul.f32 %v320_v46, %v114_v52 }
 0x156   :  { %v135_v56 = vadd.f32 %v321_v51, %v124_v53  ;;  %v115_v57 = vmul.f32 %v373_v54, %v83_v23 }
 0x157   :  { %v136_v61 = vadd.f32 %v321_v51, %v125_v58 }
 0x158   :  { %v138_v59 = vpack.c.bf16 %v135_v56, %v134_v55  ;;  %v126_v60 = vmul.f32 %v320_v46, %v115_v57 }
 0x15a   :  { %352 = vmatprep.mubr.msk.bf16.mxu0 %vm62_vm0, %v138_v59  ;;  %v137_v62 = vadd.f32 %v321_v51, %v126_v60 }
 0x15c   :  { %v139_v63 = vpack.c.bf16 %v137_v62, %v136_v61 }
 0x15e   :  { %353 = vmatmul.mubr.msk.bf16.vlgmr.msra.gmra.mxu0 %vm62_vm0, %v139_v63 }
 0x21e   :  { %v354_v1 = vpop.f32.mrf.mxu0 }
 0x21f   :  { %v212_v2 = vadd.f32 %v354_v1, %v322_v0 }
 0x220   :  { %v203_v3 = vpop.f32.mrf.mxu0 }
 0x221   :  { %v333_v4 = vpack.c.bf16 %v212_v2, %v212_v2  ;;  %v204_v5 = vadd.f32 %v322_v0, %v203_v3 }
 0x222   :  { %v355_v6 = vpop.f32.mrf.mxu0 }
 0x223   :  { %237 = vst.msk [vmem:[#allocation7 + $0x8] sm:$0xf] %vm234_vm1, %v333_v4  ;;  %v331_v7 = vpack.c.bf16 %v204_v5, %v204_v5  ;;  %v215_v8 = vadd.f32 %v355_v6, %v322_v0  ;;  %243 = vrot.lane.b32.xlu1 %v333_v4, %s486_s2 }
 0x224   :  { %v206_v9 = vpop.f32.mrf.mxu0 }
 0x225   :  { %235 = vst.msk [vmem:[#allocation7] sm:$0xf] %vm234_vm1, %v331_v7  ;;  %v334_v10 = vpack.c.bf16 %v215_v8, %v215_v8  ;;  %v207_v11 = vadd.f32 %v322_v0, %v206_v9  ;;  %239 = vrot.lane.b32.xlu0 %v331_v7, %s486_s2 }
 0x227   :  { %238 = vst.msk [vmem:[#allocation7 + $0xc] sm:$0xf] %vm234_vm1, %v334_v10  ;;  %v332_v12 = vpack.c.bf16 %v207_v11, %v207_v11  ;;  %245 = vrot.lane.b32.xlu1 %v334_v10, %s486_s2 }
 0x229   :  { %236 = vst.msk [vmem:[#allocation7 + $0x4] sm:$0xf] %vm234_vm1, %v332_v12  ;;  %255 = vrot.lane.b32.xlu0 %v331_v7, %s483_s27 }
 0x22a   :  { %425 = shalt.err (!%p422_p0)
}
 0x22b   :  { %282 = dma.vmem_to_hbm [thread:$0]  %s277_s16, 256, %s600_s5, [#allocation4], %s483_s27, %s483_s27, %s484_s28  }
 0x22c   :  { %241 = vrot.lane.b32.xlu1 %v332_v12, %s486_s2  ;;  %s488_s20 = smov [#allocation8]  }
 0x22d   :  { %259 = vrot.lane.b32.xlu0 %v333_v4, %s483_s27  ;;  %s288_s21 = sshll.u32 %s488_s20, 4  ;;  %s289_s21 = int_to_ptr.vmem [resolvable:$true] %s288_s21 }
 0x22e   :  { %s434_s5 = scalar_lea.vmem %s289_s21, 256  ;;  %p439_p2 = scmp.lt.s32.totalorder %s289_s21, %s289_s21 }
 0x22f   :  { %p435_p1 = scmp.ne.s32.totalorder %s289_s21, %s434_s5  ;;  %p440_p3 = scmp.lt.s32.totalorder %s434_s5, %s434_s5 }
 0x230   :  { %257 = vrot.lane.b32.xlu1 %v332_v12, %s483_s27 }
 0x231   :  { %p441_p4 = por %p440_p3, %p439_p2 }
 0x233   :  { %p442_p5 = pnand %p441_p4, %p435_p1 }
 0x234   :  { %261 = vrot.lane.b32.xlu1 %v334_v10, %s483_s27 }
 0x295   :  { %v244_v13 = vpop.permute.xlu1 %243 }
 0x296   :  { %253 = vst.msk [vmem:[#allocation8 + $0x8] sm:$0xf] %vm234_vm1, %v244_v13 }
 0x297   :  { %v240_v14 = vpop.permute.xlu0 %239 }
 0x298   :  { %251 = vst.msk [vmem:[#allocation8] sm:$0xf] %vm234_vm1, %v240_v14 }
 0x299   :  { %v246_v15 = vpop.permute.xlu1 %245 }
 0x29a   :  { %254 = vst.msk [vmem:[#allocation8 + $0xc] sm:$0xf] %vm234_vm1, %v246_v15 }
 0x29b   :  { %v256_v16 = vpop.permute.xlu0 %255 }
 0x29c   :  { %267 = vst.msk [vmem:[#allocation10] sm:$0xf] %vm234_vm1, %v256_v16 }
 0x29e   :  { %v242_v17 = vpop.permute.xlu1 %241 }
 0x29f   :  { %252 = vst.msk [vmem:[#allocation8 + $0x4] sm:$0xf] %vm234_vm1, %v242_v17  ;;  %v260_v18 = vpop.permute.xlu0 %259 }
 0x2a0   :  { %445 = shalt.err (!%p442_p5)
}
 0x2a1   :  { %294 = dma.vmem_to_hbm [thread:$0]  %s289_s21, 256, %s601_s6, [#allocation9], %s483_s27, %s483_s27, %s484_s28   ;;  %269 = vst.msk [vmem:[#allocation10 + $0x8] sm:$0xf] %vm234_vm1, %v260_v18 }
 0x2a2   :  { %v258_v19 = vpop.permute.xlu1 %257  ;;  %s489_s24 = smov [#allocation10]  }
 0x2a3   :  { %s300_s25 = sshll.u32 %s489_s24, 4  ;;  %268 = vst.msk [vmem:[#allocation10 + $0x4] sm:$0xf] %vm234_vm1, %v258_v19  ;;  %s301_s25 = int_to_ptr.vmem [resolvable:$true] %s300_s25 }
 0x2a4   :  { %s454_s26 = scalar_lea.vmem %s301_s25, 256  ;;  %p459_p7 = scmp.lt.s32.totalorder %s301_s25, %s301_s25 }
 0x2a5   :  { %p455_p6 = scmp.ne.s32.totalorder %s301_s25, %s454_s26  ;;  %p460_p8 = scmp.lt.s32.totalorder %s454_s26, %s454_s26 }
 0x2a6   :  { %v262_v20 = vpop.permute.xlu1 %261 }
 0x2a7   :  { %270 = vst.msk [vmem:[#allocation10 + $0xc] sm:$0xf] %vm234_vm1, %v262_v20  ;;  %p461_p9 = por %p460_p8, %p459_p7 }
 0x2a9   :  { %p462_p10 = pnand %p461_p9, %p455_p6 }
 0x2ab   :  { %465 = shalt.err (!%p462_p10)
}
 0x2ac   :  { %306 = dma.vmem_to_hbm [thread:$0]  %s301_s25, 256, %s602_s7, [#allocation9], %s483_s27, %s483_s27, %s484_s28  }
 0x2ad   :  { %478 = dma.done.wait [#allocation4], 256  }
 0x2ae   :  { %479 = vsyncadd [#allocation4], 4294967040 }
 0x2af   :  { %480 = dma.done.wait [#allocation9], 512  }
 0x2b0   :  { %481 = vsyncadd [#allocation9], 4294966784 }
 0x2b1   :  { %316 = vsyncpa [#allocation3], 1 }
 0x2b2   :  { %317 = vsyncpa [#allocation6], 1 }
 0x2b3   :  { %318 = vsyncpa [#allocation4], 1 }
 0x2b4   :  { %319 = vsyncpa [#allocation9], 1 }

</bundles_post_ra>
